<compile_context>
chip_gen: v5e
topology: v5e:2x2
jax: 0.10.0
libtpu: 0.0.40
codegen_flags: <defaults>
</compile_context>

<pallas_src>
import jax
import jax.numpy as jnp
from jax.experimental import pallas as pl
from jax.experimental.pallas import tpu as pltpu

_LANE = 128   # lane width: pad all feature dims to a multiple of this
_SUB = 16     # bf16 sublane tile: pad node/edge counts to a multiple of this


def _round_up(n, m):
    return ((n + m - 1) // m) * m


def _pad2(x, rows, cols, dtype):
    x = x.astype(dtype)
    r, c = x.shape
    return jnp.pad(x, ((0, rows - r), (0, cols - c)))


# ----------------------------------------------------------------------------
# Fused Pallas kernel: hetero 2-layer SAGE encoder + edge decoder
# ----------------------------------------------------------------------------
def _fused_forward_kernel(
    # graph / features (bf16)
    adj_u2m_ref, adj_m2u_ref, xu_ref, xm_ref,
    # conv1, dst = movie (user->movie) ; dst = user (movie->user)
    wl1_m_ref, bl1_m_ref, wr1_m_ref,
    wl1_u_ref, bl1_u_ref, wr1_u_ref,
    # conv2
    wl2_m_ref, bl2_m_ref, wr2_m_ref,
    wl2_u_ref, bl2_u_ref, wr2_u_ref,
    # decoder
    sel_u_ref, sel_m_ref, w1u_ref, w1m_ref, b1_ref, w2_ref, b2_ref,
    # output
    out_ref,
    # VMEM scratch (intermediates stay resident, no HBM round trips)
    h_user, h_movie, z_user, z_movie,
):
    f32 = jnp.float32

    def sage(a, xs, xd, wl, bl, wr, relu):
        # mean aggregation as normalized-adjacency matmul (MXU), f32 accumulation
        agg = jnp.dot(a, xs, preferred_element_type=f32)
        out = (jnp.dot(agg, wl, preferred_element_type=f32)
               + jnp.dot(xd, wr, preferred_element_type=f32)
               + bl)
        return jnp.maximum(out, 0.0) if relu else out

    # ---- hetero SAGE layer 1 (+ ReLU) ----
    h_movie[...] = sage(adj_u2m_ref[...], xu_ref[...], xm_ref[...],
                        wl1_m_ref[...], bl1_m_ref[...], wr1_m_ref[...], True)
    h_user[...] = sage(adj_m2u_ref[...], xm_ref[...], xu_ref[...],
                       wl1_u_ref[...], bl1_u_ref[...], wr1_u_ref[...], True)

    # ---- layer 2 (no ReLU) ----
    z_movie[...] = sage(adj_u2m_ref[...], h_user[...], h_movie[...],
                        wl2_m_ref[...], bl2_m_ref[...], wr2_m_ref[...], False)
    z_user[...] = sage(adj_m2u_ref[...], h_movie[...], h_user[...],
                       wl2_u_ref[...], bl2_u_ref[...], wr2_u_ref[...], False)

    # ---- edge decoder (fused): one-hot gather on MXU, lin1+ReLU, lin2 on VPU ----
    zu = jnp.dot(sel_u_ref[...], z_user[...], preferred_element_type=f32)
    zm = jnp.dot(sel_m_ref[...], z_movie[...], preferred_element_type=f32)
    # lin1 on the concatenated [z_user | z_movie] expressed with a split weight
    # (mathematically identical, avoids an in-kernel lane concat).
    h = (jnp.dot(zu, w1u_ref[...], preferred_element_type=f32)
         + jnp.dot(zm, w1m_ref[...], preferred_element_type=f32)
         + b1_ref[...])
    h = jnp.maximum(h, 0.0)
    # lin2 ([hidden, 1]) as VPU multiply + lane reduction instead of an N=1 matmul.
    score = jnp.sum(h * w2_ref[...], axis=-1, keepdims=True) + b2_ref[0]
    # Lane-dense store: broadcast the scalar score across all 128 lanes.
    out_ref[...] = jnp.broadcast_to(score, out_ref.shape)


# ----------------------------------------------------------------------------
# Wrapper: padding / casting / one fused pallas_call
# ----------------------------------------------------------------------------
def model_forward(params, x_dict, adj_u2m, adj_m2u, edge_label_index):
    bf16, f32 = jnp.bfloat16, jnp.float32
    x_user, x_movie = x_dict["user"], x_dict["movie"]
    n_user, du = x_user.shape
    n_movie, dm = x_movie.shape
    hidden = params["conv1_u2m"]["w_l"].shape[1]
    row, col = edge_label_index
    n_edge = row.shape[0]

    up, mp, ep = _round_up(n_user, _SUB), _round_up(n_movie, _SUB), _round_up(n_edge, _SUB)
    dup, dmp, hp = _round_up(du, _LANE), _round_up(dm, _LANE), _round_up(hidden, _LANE)

    # padded bf16 MXU operands (f32 accumulation happens inside the kernel)
    a_u2m = _pad2(adj_u2m, mp, up, bf16)
    a_m2u = _pad2(adj_m2u, up, mp, bf16)
    xu = _pad2(x_user, up, dup, bf16)
    xm = _pad2(x_movie, mp, dmp, bf16)

    def conv(p, in_src_p, in_dst_p):
        return (_pad2(p["w_l"], in_src_p, hp, bf16),
                _pad2(p["b_l"], 1, hp, f32),
                _pad2(p["w_r"], in_dst_p, hp, bf16))

    wl1m, bl1m, wr1m = conv(params["conv1_u2m"], dup, dmp)   # dst = movie
    wl1u, bl1u, wr1u = conv(params["conv1_m2u"], dmp, dup)   # dst = user
    wl2m, bl2m, wr2m = conv(params["conv2_u2m"], hp, hp)
    wl2u, bl2u, wr2u = conv(params["conv2_m2u"], hp, hp)

    # edge-label gather as one-hot selection matrices (fused in-kernel via MXU)
    sel_u = _pad2(jax.nn.one_hot(row, n_user, dtype=f32), ep, up, bf16)
    sel_m = _pad2(jax.nn.one_hot(col, n_movie, dtype=f32), ep, mp, bf16)

    w1 = params["lin1"]["w"]                              # (2*hidden, hidden), pre-transposed
    w1u = _pad2(w1[:hidden], hp, hp, bf16)                # half applied to z_user
    w1m = _pad2(w1[hidden:], hp, hp, bf16)                # half applied to z_movie
    b1 = _pad2(params["lin1"]["b"], 1, hp, f32)
    w2 = _pad2(params["lin2"]["w"].T, 1, hp, f32)         # (1, hp) lane vector, used on VPU
    b2 = params["lin2"]["b"].reshape(-1).astype(f32)      # (1,), SMEM scalar

    vmem = pl.BlockSpec(memory_space=pltpu.MemorySpace.VMEM)
    smem = pl.BlockSpec(memory_space=pltpu.MemorySpace.SMEM)

    out = pl.pallas_call(
        _fused_forward_kernel,
        out_shape=jax.ShapeDtypeStruct((ep, _LANE), f32),
        in_specs=[vmem] * 22 + [smem],
        out_specs=vmem,
        scratch_shapes=[
            pltpu.VMEM((up, hp), f32),   # h_user
            pltpu.VMEM((mp, hp), f32),   # h_movie
            pltpu.VMEM((up, hp), f32),   # z_user
            pltpu.VMEM((mp, hp), f32),   # z_movie
        ],
        compiler_params=pltpu.CompilerParams(vmem_limit_bytes=32 * 1024 * 1024),
    )(a_u2m, a_m2u, xu, xm,
      wl1m, bl1m, wr1m, wl1u, bl1u, wr1u,
      wl2m, bl2m, wr2m, wl2u, bl2u, wr2u,
      sel_u, sel_m, w1u, w1m, b1, w2, b2)

    return out[:n_edge, 0]   # .view(-1)


# ----------------------------------------------------------------------------
# Glue: graph preprocessing and parameter init (plain JAX)
# ----------------------------------------------------------------------------
def mean_adjacency(dst_idx, src_idx, n_dst, n_src):
    """Dense normalized adjacency so that A @ x_src == scatter-mean of messages."""
    counts = jnp.zeros((n_dst, n_src), jnp.float32).at[dst_idx, src_idx].add(1.0)
    deg = counts.sum(axis=1, keepdims=True)
    return counts / jnp.maximum(deg, 1.0)


def _linear_params(key, in_f, out_f, bias=True):
    kw, kb = jax.random.split(key)
    scale = 1.0 / jnp.sqrt(jnp.float32(in_f))
    w = jax.random.uniform(kw, (in_f, out_f), jnp.float32, -scale, scale)  # pre-transposed
    b = (jax.random.uniform(kb, (1, out_f), jnp.float32, -scale, scale)
         if bias else jnp.zeros((1, out_f), jnp.float32))
    return w, b


def _sage_params(key, in_src, in_dst, out_ch):
    k1, k2 = jax.random.split(key)
    w_l, b_l = _linear_params(k1, in_src, out_ch, bias=True)    # applied to aggregated src
    w_r, _ = _linear_params(k2, in_dst, out_ch, bias=False)     # applied to x_dst (root)
    return {"w_l": w_l, "b_l": b_l, "w_r": w_r}


def init_model_params(key, user_dim, movie_dim, hidden):
    ks = jax.random.split(key, 6)
    params = {
        "conv1_u2m": _sage_params(ks[0], user_dim, movie_dim, hidden),   # user -> movie
        "conv1_m2u": _sage_params(ks[1], movie_dim, user_dim, hidden),   # movie -> user
        "conv2_u2m": _sage_params(ks[2], hidden, hidden, hidden),
        "conv2_m2u": _sage_params(ks[3], hidden, hidden, hidden),
    }
    w1, b1 = _linear_params(ks[4], 2 * hidden, hidden, bias=True)
    w2, b2 = _linear_params(ks[5], hidden, 1, bias=True)
    params["lin1"] = {"w": w1, "b": b1}
    params["lin2"] = {"w": w2, "b": b2}
    return params


# Pure-JAX reference (mirrors the kernel's bf16 input cast; compute in f32).
def _reference_forward(params, x_dict, adj_u2m, adj_m2u, edge_label_index):
    q = lambda t: t.astype(jnp.bfloat16).astype(jnp.float32)

    def sage(a, xs, xd, p, relu):
        out = (q(a) @ xs) @ q(p["w_l"]) + p["b_l"] + xd @ q(p["w_r"])
        return jnp.maximum(out, 0.0) if relu else out

    xu, xm = q(x_dict["user"]), q(x_dict["movie"])
    h_m = sage(adj_u2m, xu, xm, params["conv1_u2m"], True)
    h_u = sage(adj_m2u, xm, xu, params["conv1_m2u"], True)
    z_m = sage(adj_u2m, h_u, h_m, params["conv2_u2m"], False)
    z_u = sage(adj_m2u, h_m, h_u, params["conv2_m2u"], False)
    row, col = edge_label_index
    z = jnp.concatenate([z_u[row], z_m[col]], axis=-1)
    h = jnp.maximum(z @ q(params["lin1"]["w"]) + params["lin1"]["b"], 0.0)
    return (h @ params["lin2"]["w"] + params["lin2"]["b"]).reshape(-1)


if __name__ == "__main__":
    key = jax.random.PRNGKey(0)
    k_feat_u, k_feat_m, k_eu, k_em, k_lu, k_lm, k_params = jax.random.split(key, 7)

    num_users, num_movies = 8, 12
    user_dim, movie_dim = 16, 24
    hidden = 32
    num_edges, num_label_edges = 40, 8

    x_dict = {
        "user": jax.random.normal(k_feat_u, (num_users, user_dim), jnp.float32),
        "movie": jax.random.normal(k_feat_m, (num_movies, movie_dim), jnp.float32),
    }

    # ('user','rates','movie') edges; reverse type is its transpose
    e_user = jax.random.randint(k_eu, (num_edges,), 0, num_users)
    e_movie = jax.random.randint(k_em, (num_edges,), 0, num_movies)
    adj_u2m = mean_adjacency(e_movie, e_user, num_movies, num_users)   # movie <- user
    adj_m2u = mean_adjacency(e_user, e_movie, num_users, num_movies)   # user  <- movie

    edge_label_index = (
        jax.random.randint(k_lu, (num_label_edges,), 0, num_users),
        jax.random.randint(k_lm, (num_label_edges,), 0, num_movies),
    )

    params = init_model_params(k_params, user_dim, movie_dim, hidden)

    out = model_forward(params, x_dict, adj_u2m, adj_m2u, edge_label_index)
    out = jax.block_until_ready(out)

    ref = _reference_forward(params, x_dict, adj_u2m, adj_m2u, edge_label_index)
    assert out.shape == (num_label_edges,)
    assert jnp.allclose(out, ref, atol=2e-2, rtol=2e-2), float(jnp.max(jnp.abs(out - ref)))

    print("KERNEL_OK")
</pallas_src>

<mosaic_0001>
module attributes {stable_mosaic.version = 11 : i64} {
  func.func @_fused_forward_kernel(%arg0: memref<16x16xbf16, #tpu.memory_space<vmem>>, %arg1: memref<16x16xbf16, #tpu.memory_space<vmem>>, %arg2: memref<16x128xbf16, #tpu.memory_space<vmem>>, %arg3: memref<16x128xbf16, #tpu.memory_space<vmem>>, %arg4: memref<128x128xbf16, #tpu.memory_space<vmem>>, %arg5: memref<1x128xf32, #tpu.memory_space<vmem>>, %arg6: memref<128x128xbf16, #tpu.memory_space<vmem>>, %arg7: memref<128x128xbf16, #tpu.memory_space<vmem>>, %arg8: memref<1x128xf32, #tpu.memory_space<vmem>>, %arg9: memref<128x128xbf16, #tpu.memory_space<vmem>>, %arg10: memref<128x128xbf16, #tpu.memory_space<vmem>>, %arg11: memref<1x128xf32, #tpu.memory_space<vmem>>, %arg12: memref<128x128xbf16, #tpu.memory_space<vmem>>, %arg13: memref<128x128xbf16, #tpu.memory_space<vmem>>, %arg14: memref<1x128xf32, #tpu.memory_space<vmem>>, %arg15: memref<128x128xbf16, #tpu.memory_space<vmem>>, %arg16: memref<16x16xbf16, #tpu.memory_space<vmem>>, %arg17: memref<16x16xbf16, #tpu.memory_space<vmem>>, %arg18: memref<128x128xbf16, #tpu.memory_space<vmem>>, %arg19: memref<128x128xbf16, #tpu.memory_space<vmem>>, %arg20: memref<1x128xf32, #tpu.memory_space<vmem>>, %arg21: memref<1x128xf32, #tpu.memory_space<vmem>>, %arg22: memref<1xf32, #tpu.memory_space<smem>>, %arg23: memref<16x128xf32, #tpu.memory_space<vmem>>, %arg24: memref<16x128xf32, #tpu.memory_space<vmem>>, %arg25: memref<16x128xf32, #tpu.memory_space<vmem>>, %arg26: memref<16x128xf32, #tpu.memory_space<vmem>>, %arg27: memref<16x128xf32, #tpu.memory_space<vmem>>) attributes {dimension_semantics = [], scalar_prefetch = 0 : i64, scratch_operands = 4 : i64, tpu.core_type = #tpu.core_type<tc>} {
    %c0 = arith.constant 0 : index
    %c0_0 = arith.constant 0 : index
    %0 = vector.load %arg0[%c0, %c0_0] : memref<16x16xbf16, #tpu.memory_space<vmem>>, vector<16x16xbf16>
    %c0_1 = arith.constant 0 : index
    %c0_2 = arith.constant 0 : index
    %1 = vector.load %arg2[%c0_1, %c0_2] : memref<16x128xbf16, #tpu.memory_space<vmem>>, vector<16x128xbf16>
    %c0_3 = arith.constant 0 : index
    %c0_4 = arith.constant 0 : index
    %2 = vector.load %arg3[%c0_3, %c0_4] : memref<16x128xbf16, #tpu.memory_space<vmem>>, vector<16x128xbf16>
    %c0_5 = arith.constant 0 : index
    %c0_6 = arith.constant 0 : index
    %3 = vector.load %arg4[%c0_5, %c0_6] : memref<128x128xbf16, #tpu.memory_space<vmem>>, vector<128x128xbf16>
    %c0_7 = arith.constant 0 : index
    %c0_8 = arith.constant 0 : index
    %4 = vector.load %arg5[%c0_7, %c0_8] : memref<1x128xf32, #tpu.memory_space<vmem>>, vector<1x128xf32>
    %c0_9 = arith.constant 0 : index
    %c0_10 = arith.constant 0 : index
    %5 = vector.load %arg6[%c0_9, %c0_10] : memref<128x128xbf16, #tpu.memory_space<vmem>>, vector<128x128xbf16>
    %cst = arith.constant dense<0.000000e+00> : vector<16x128xf32>
    %6 = tpu.matmul %0, %1, %cst {dimension_numbers = #tpu.dot_dimension_numbers<[1], [0], [0], [1], [0, 0, 1, 1], [], []>} : vector<16x16xbf16>, vector<16x128xbf16>, vector<16x128xf32> -> vector<16x128xf32>
    %cst_11 = arith.constant dense<0.000000e+00> : vector<16x128xf32>
    %7 = tpu.matmul %6, %3, %cst_11 {dimension_numbers = #tpu.dot_dimension_numbers<[1], [0], [0], [1], [0, 0, 1, 1], [], []>} : vector<16x128xf32>, vector<128x128xbf16>, vector<16x128xf32> -> vector<16x128xf32>
    %cst_12 = arith.constant dense<0.000000e+00> : vector<16x128xf32>
    %8 = tpu.matmul %2, %5, %cst_12 {dimension_numbers = #tpu.dot_dimension_numbers<[1], [0], [0], [1], [0, 0, 1, 1], [], []>} : vector<16x128xbf16>, vector<128x128xbf16>, vector<16x128xf32> -> vector<16x128xf32>
    %9 = arith.addf %7, %8 : vector<16x128xf32>
    %10 = vector.broadcast %4 : vector<1x128xf32> to vector<16x128xf32>
    %11 = arith.addf %9, %10 : vector<16x128xf32>
    %cst_13 = arith.constant 0.000000e+00 : f32
    %12 = vector.broadcast %cst_13 : f32 to vector<16x128xf32>
    %13 = arith.maximumf %11, %12 : vector<16x128xf32>
    %c0_14 = arith.constant 0 : index
    %c0_15 = arith.constant 0 : index
    %14 = vector.load %arg25[%c0_14, %c0_15] : memref<16x128xf32, #tpu.memory_space<vmem>>, vector<16x128xf32>
    tpu.vector_store %arg25[%c0_14, %c0_15], %13 {strides = array<i32>} : memref<16x128xf32, #tpu.memory_space<vmem>>, vector<16x128xf32>,
    %c0_16 = arith.constant 0 : index
    %c0_17 = arith.constant 0 : index
    %15 = vector.load %arg1[%c0_16, %c0_17] : memref<16x16xbf16, #tpu.memory_space<vmem>>, vector<16x16xbf16>
    %c0_18 = arith.constant 0 : index
    %c0_19 = arith.constant 0 : index
    %16 = vector.load %arg3[%c0_18, %c0_19] : memref<16x128xbf16, #tpu.memory_space<vmem>>, vector<16x128xbf16>
    %c0_20 = arith.constant 0 : index
    %c0_21 = arith.constant 0 : index
    %17 = vector.load %arg2[%c0_20, %c0_21] : memref<16x128xbf16, #tpu.memory_space<vmem>>, vector<16x128xbf16>
    %c0_22 = arith.constant 0 : index
    %c0_23 = arith.constant 0 : index
    %18 = vector.load %arg7[%c0_22, %c0_23] : memref<128x128xbf16, #tpu.memory_space<vmem>>, vector<128x128xbf16>
    %c0_24 = arith.constant 0 : index
    %c0_25 = arith.constant 0 : index
    %19 = vector.load %arg8[%c0_24, %c0_25] : memref<1x128xf32, #tpu.memory_space<vmem>>, vector<1x128xf32>
    %c0_26 = arith.constant 0 : index
    %c0_27 = arith.constant 0 : index
    %20 = vector.load %arg9[%c0_26, %c0_27] : memref<128x128xbf16, #tpu.memory_space<vmem>>, vector<128x128xbf16>
    %cst_28 = arith.constant dense<0.000000e+00> : vector<16x128xf32>
    %21 = tpu.matmul %15, %16, %cst_28 {dimension_numbers = #tpu.dot_dimension_numbers<[1], [0], [0], [1], [0, 0, 1, 1], [], []>} : vector<16x16xbf16>, vector<16x128xbf16>, vector<16x128xf32> -> vector<16x128xf32>
    %cst_29 = arith.constant dense<0.000000e+00> : vector<16x128xf32>
    %22 = tpu.matmul %21, %18, %cst_29 {dimension_numbers = #tpu.dot_dimension_numbers<[1], [0], [0], [1], [0, 0, 1, 1], [], []>} : vector<16x128xf32>, vector<128x128xbf16>, vector<16x128xf32> -> vector<16x128xf32>
    %cst_30 = arith.constant dense<0.000000e+00> : vector<16x128xf32>
    %23 = tpu.matmul %17, %20, %cst_30 {dimension_numbers = #tpu.dot_dimension_numbers<[1], [0], [0], [1], [0, 0, 1, 1], [], []>} : vector<16x128xbf16>, vector<128x128xbf16>, vector<16x128xf32> -> vector<16x128xf32>
    %24 = arith.addf %22, %23 : vector<16x128xf32>
    %25 = vector.broadcast %19 : vector<1x128xf32> to vector<16x128xf32>
    %26 = arith.addf %24, %25 : vector<16x128xf32>
    %cst_31 = arith.constant 0.000000e+00 : f32
    %27 = vector.broadcast %cst_31 : f32 to vector<16x128xf32>
    %28 = arith.maximumf %26, %27 : vector<16x128xf32>
    %c0_32 = arith.constant 0 : index
    %c0_33 = arith.constant 0 : index
    %29 = vector.load %arg24[%c0_32, %c0_33] : memref<16x128xf32, #tpu.memory_space<vmem>>, vector<16x128xf32>
    tpu.vector_store %arg24[%c0_32, %c0_33], %28 {strides = array<i32>} : memref<16x128xf32, #tpu.memory_space<vmem>>, vector<16x128xf32>,
    %c0_34 = arith.constant 0 : index
    %c0_35 = arith.constant 0 : index
    %30 = vector.load %arg0[%c0_34, %c0_35] : memref<16x16xbf16, #tpu.memory_space<vmem>>, vector<16x16xbf16>
    %c0_36 = arith.constant 0 : index
    %c0_37 = arith.constant 0 : index
    %31 = vector.load %arg24[%c0_36, %c0_37] : memref<16x128xf32, #tpu.memory_space<vmem>>, vector<16x128xf32>
    %c0_38 = arith.constant 0 : index
    %c0_39 = arith.constant 0 : index
    %32 = vector.load %arg25[%c0_38, %c0_39] : memref<16x128xf32, #tpu.memory_space<vmem>>, vector<16x128xf32>
    %c0_40 = arith.constant 0 : index
    %c0_41 = arith.constant 0 : index
    %33 = vector.load %arg10[%c0_40, %c0_41] : memref<128x128xbf16, #tpu.memory_space<vmem>>, vector<128x128xbf16>
    %c0_42 = arith.constant 0 : index
    %c0_43 = arith.constant 0 : index
    %34 = vector.load %arg11[%c0_42, %c0_43] : memref<1x128xf32, #tpu.memory_space<vmem>>, vector<1x128xf32>
    %c0_44 = arith.constant 0 : index
    %c0_45 = arith.constant 0 : index
    %35 = vector.load %arg12[%c0_44, %c0_45] : memref<128x128xbf16, #tpu.memory_space<vmem>>, vector<128x128xbf16>
    %cst_46 = arith.constant dense<0.000000e+00> : vector<16x128xf32>
    %36 = tpu.matmul %30, %31, %cst_46 {dimension_numbers = #tpu.dot_dimension_numbers<[1], [0], [0], [1], [0, 0, 1, 1], [], []>} : vector<16x16xbf16>, vector<16x128xf32>, vector<16x128xf32> -> vector<16x128xf32>
    %cst_47 = arith.constant dense<0.000000e+00> : vector<16x128xf32>
    %37 = tpu.matmul %36, %33, %cst_47 {dimension_numbers = #tpu.dot_dimension_numbers<[1], [0], [0], [1], [0, 0, 1, 1], [], []>} : vector<16x128xf32>, vector<128x128xbf16>, vector<16x128xf32> -> vector<16x128xf32>
    %cst_48 = arith.constant dense<0.000000e+00> : vector<16x128xf32>
    %38 = tpu.matmul %32, %35, %cst_48 {dimension_numbers = #tpu.dot_dimension_numbers<[1], [0], [0], [1], [0, 0, 1, 1], [], []>} : vector<16x128xf32>, vector<128x128xbf16>, vector<16x128xf32> -> vector<16x128xf32>
    %39 = arith.addf %37, %38 : vector<16x128xf32>
    %40 = vector.broadcast %34 : vector<1x128xf32> to vector<16x128xf32>
    %41 = arith.addf %39, %40 : vector<16x128xf32>
    %c0_49 = arith.constant 0 : index
    %c0_50 = arith.constant 0 : index
    %42 = vector.load %arg27[%c0_49, %c0_50] : memref<16x128xf32, #tpu.memory_space<vmem>>, vector<16x128xf32>
    tpu.vector_store %arg27[%c0_49, %c0_50], %41 {strides = array<i32>} : memref<16x128xf32, #tpu.memory_space<vmem>>, vector<16x128xf32>,
    %c0_51 = arith.constant 0 : index
    %c0_52 = arith.constant 0 : index
    %43 = vector.load %arg1[%c0_51, %c0_52] : memref<16x16xbf16, #tpu.memory_space<vmem>>, vector<16x16xbf16>
    %c0_53 = arith.constant 0 : index
    %c0_54 = arith.constant 0 : index
    %44 = vector.load %arg25[%c0_53, %c0_54] : memref<16x128xf32, #tpu.memory_space<vmem>>, vector<16x128xf32>
    %c0_55 = arith.constant 0 : index
    %c0_56 = arith.constant 0 : index
    %45 = vector.load %arg24[%c0_55, %c0_56] : memref<16x128xf32, #tpu.memory_space<vmem>>, vector<16x128xf32>
    %c0_57 = arith.constant 0 : index
    %c0_58 = arith.constant 0 : index
    %46 = vector.load %arg13[%c0_57, %c0_58] : memref<128x128xbf16, #tpu.memory_space<vmem>>, vector<128x128xbf16>
    %c0_59 = arith.constant 0 : index
    %c0_60 = arith.constant 0 : index
    %47 = vector.load %arg14[%c0_59, %c0_60] : memref<1x128xf32, #tpu.memory_space<vmem>>, vector<1x128xf32>
    %c0_61 = arith.constant 0 : index
    %c0_62 = arith.constant 0 : index
    %48 = vector.load %arg15[%c0_61, %c0_62] : memref<128x128xbf16, #tpu.memory_space<vmem>>, vector<128x128xbf16>
    %cst_63 = arith.constant dense<0.000000e+00> : vector<16x128xf32>
    %49 = tpu.matmul %43, %44, %cst_63 {dimension_numbers = #tpu.dot_dimension_numbers<[1], [0], [0], [1], [0, 0, 1, 1], [], []>} : vector<16x16xbf16>, vector<16x128xf32>, vector<16x128xf32> -> vector<16x128xf32>
    %cst_64 = arith.constant dense<0.000000e+00> : vector<16x128xf32>
    %50 = tpu.matmul %49, %46, %cst_64 {dimension_numbers = #tpu.dot_dimension_numbers<[1], [0], [0], [1], [0, 0, 1, 1], [], []>} : vector<16x128xf32>, vector<128x128xbf16>, vector<16x128xf32> -> vector<16x128xf32>
    %cst_65 = arith.constant dense<0.000000e+00> : vector<16x128xf32>
    %51 = tpu.matmul %45, %48, %cst_65 {dimension_numbers = #tpu.dot_dimension_numbers<[1], [0], [0], [1], [0, 0, 1, 1], [], []>} : vector<16x128xf32>, vector<128x128xbf16>, vector<16x128xf32> -> vector<16x128xf32>
    %52 = arith.addf %50, %51 : vector<16x128xf32>
    %53 = vector.broadcast %47 : vector<1x128xf32> to vector<16x128xf32>
    %54 = arith.addf %52, %53 : vector<16x128xf32>
    %c0_66 = arith.constant 0 : index
    %c0_67 = arith.constant 0 : index
    %55 = vector.load %arg26[%c0_66, %c0_67] : memref<16x128xf32, #tpu.memory_space<vmem>>, vector<16x128xf32>
    tpu.vector_store %arg26[%c0_66, %c0_67], %54 {strides = array<i32>} : memref<16x128xf32, #tpu.memory_space<vmem>>, vector<16x128xf32>,
    %c0_68 = arith.constant 0 : index
    %c0_69 = arith.constant 0 : index
    %56 = vector.load %arg16[%c0_68, %c0_69] : memref<16x16xbf16, #tpu.memory_space<vmem>>, vector<16x16xbf16>
    %c0_70 = arith.constant 0 : index
    %c0_71 = arith.constant 0 : index
    %57 = vector.load %arg26[%c0_70, %c0_71] : memref<16x128xf32, #tpu.memory_space<vmem>>, vector<16x128xf32>
    %cst_72 = arith.constant dense<0.000000e+00> : vector<16x128xf32>
    %58 = tpu.matmul %56, %57, %cst_72 {dimension_numbers = #tpu.dot_dimension_numbers<[1], [0], [0], [1], [0, 0, 1, 1], [], []>} : vector<16x16xbf16>, vector<16x128xf32>, vector<16x128xf32> -> vector<16x128xf32>
    %c0_73 = arith.constant 0 : index
    %c0_74 = arith.constant 0 : index
    %59 = vector.load %arg17[%c0_73, %c0_74] : memref<16x16xbf16, #tpu.memory_space<vmem>>, vector<16x16xbf16>
    %c0_75 = arith.constant 0 : index
    %c0_76 = arith.constant 0 : index
    %60 = vector.load %arg27[%c0_75, %c0_76] : memref<16x128xf32, #tpu.memory_space<vmem>>, vector<16x128xf32>
    %cst_77 = arith.constant dense<0.000000e+00> : vector<16x128xf32>
    %61 = tpu.matmul %59, %60, %cst_77 {dimension_numbers = #tpu.dot_dimension_numbers<[1], [0], [0], [1], [0, 0, 1, 1], [], []>} : vector<16x16xbf16>, vector<16x128xf32>, vector<16x128xf32> -> vector<16x128xf32>
    %c0_78 = arith.constant 0 : index
    %c0_79 = arith.constant 0 : index
    %62 = vector.load %arg18[%c0_78, %c0_79] : memref<128x128xbf16, #tpu.memory_space<vmem>>, vector<128x128xbf16>
    %cst_80 = arith.constant dense<0.000000e+00> : vector<16x128xf32>
    %63 = tpu.matmul %58, %62, %cst_80 {dimension_numbers = #tpu.dot_dimension_numbers<[1], [0], [0], [1], [0, 0, 1, 1], [], []>} : vector<16x128xf32>, vector<128x128xbf16>, vector<16x128xf32> -> vector<16x128xf32>
    %c0_81 = arith.constant 0 : index
    %c0_82 = arith.constant 0 : index
    %64 = vector.load %arg19[%c0_81, %c0_82] : memref<128x128xbf16, #tpu.memory_space<vmem>>, vector<128x128xbf16>
    %cst_83 = arith.constant dense<0.000000e+00> : vector<16x128xf32>
    %65 = tpu.matmul %61, %64, %cst_83 {dimension_numbers = #tpu.dot_dimension_numbers<[1], [0], [0], [1], [0, 0, 1, 1], [], []>} : vector<16x128xf32>, vector<128x128xbf16>, vector<16x128xf32> -> vector<16x128xf32>
    %66 = arith.addf %63, %65 : vector<16x128xf32>
    %c0_84 = arith.constant 0 : index
    %c0_85 = arith.constant 0 : index
    %67 = vector.load %arg20[%c0_84, %c0_85] : memref<1x128xf32, #tpu.memory_space<vmem>>, vector<1x128xf32>
    %68 = vector.broadcast %67 : vector<1x128xf32> to vector<16x128xf32>
    %69 = arith.addf %66, %68 : vector<16x128xf32>
    %cst_86 = arith.constant 0.000000e+00 : f32
    %70 = vector.broadcast %cst_86 : f32 to vector<16x128xf32>
    %71 = arith.maximumf %69, %70 : vector<16x128xf32>
    %c0_87 = arith.constant 0 : index
    %c0_88 = arith.constant 0 : index
    %72 = vector.load %arg21[%c0_87, %c0_88] : memref<1x128xf32, #tpu.memory_space<vmem>>, vector<1x128xf32>
    %73 = vector.broadcast %72 : vector<1x128xf32> to vector<16x128xf32>
    %74 = arith.mulf %71, %73 : vector<16x128xf32>
    %cst_89 = arith.constant dense<0.000000e+00> : vector<16xf32>
    %75 = vector.multi_reduction <add>, %74, %cst_89 [1] : vector<16x128xf32> to vector<16xf32>
    %76 = vector.shape_cast %75 : vector<16xf32> to vector<16x1xf32>
    %c0_90 = arith.constant 0 : index
    %77 = memref.load %arg22[%c0_90] : memref<1xf32, #tpu.memory_space<smem>>
    %78 = vector.broadcast %77 : f32 to vector<16x1xf32>
    %79 = arith.addf %76, %78 : vector<16x1xf32>
    %80 = vector.shape_cast %79 : vector<16x1xf32> to vector<16x1xf32>
    %81 = vector.broadcast %80 : vector<16x1xf32> to vector<16x128xf32>
    %c0_91 = arith.constant 0 : index
    %c0_92 = arith.constant 0 : index
    %82 = vector.load %arg23[%c0_91, %c0_92] : memref<16x128xf32, #tpu.memory_space<vmem>>, vector<16x128xf32>
    tpu.vector_store %arg23[%c0_91, %c0_92], %81 {strides = array<i32>} : memref<16x128xf32, #tpu.memory_space<vmem>>, vector<16x128xf32>,
    return
  }
}

</mosaic_0001>

<bundles_post_ra>
// kernel: tpu_custom_call.1
= control target key start
LH: loop header
LB: loop body
LE: loop exit
PB: predicated region body
PF: predicated region fallthrough
CT: control target
= control target key end

     0   :  { %s2672_s0 = inlined_call_operand.hbm [shape: bf16[16,16], index: 0, kind: input, shape index: {}]   ;;  %s2673_s1 = inlined_call_operand.hbm [shape: bf16[16,16], index: 1, kind: input, shape index: {}]   ;;  %s2674_s2 = inlined_call_operand.hbm [shape: bf16[16,128], index: 2, kind: input, shape index: {}]   ;;  %s2675_s3 = inlined_call_operand.hbm [shape: bf16[16,128], index: 3, kind: input, shape index: {}]   ;;  %s2676_s4 = inlined_call_operand.hbm [shape: bf16[128,128], index: 4, kind: input, shape index: {}]   ;;  %s2677_s5 = inlined_call_operand.hbm [shape: f32[1,128], index: 5, kind: input, shape index: {}]   ;;  %s2678_s6 = inlined_call_operand.hbm [shape: bf16[128,128], index: 6, kind: input, shape index: {}]   ;;  %s2679_s7 = inlined_call_operand.hbm [shape: bf16[128,128], index: 7, kind: input, shape index: {}]   ;;  %s2680_s8 = inlined_call_operand.hbm [shape: f32[1,128], index: 8, kind: input, shape index: {}]   ;;  %s2681_s9 = inlined_call_operand.hbm [shape: bf16[128,128], index: 9, kind: input, shape index: {}]   ;;  %s2682_s10 = inlined_call_operand.hbm [shape: bf16[128,128], index: 10, kind: input, shape index: {}]   ;;  %s2683_s11 = inlined_call_operand.hbm [shape: f32[1,128], index: 11, kind: input, shape index: {}]   ;;  %s2684_s12 = inlined_call_operand.hbm [shape: bf16[128,128], index: 12, kind: input, shape index: {}]   ;;  %s2685_s13 = inlined_call_operand.hbm [shape: bf16[128,128], index: 13, kind: input, shape index: {}]   ;;  %s2686_s14 = inlined_call_operand.hbm [shape: f32[1,128], index: 14, kind: input, shape index: {}]   ;;  %s2687_s15 = inlined_call_operand.hbm [shape: bf16[128,128], index: 15, kind: input, shape index: {}]   ;;  %s2688_s16 = inlined_call_operand.vmem [shape: bf16[16,16], index: 16, kind: input, shape index: {}]   ;;  %s2689_s17 = inlined_call_operand.vmem [shape: bf16[16,16], index: 17, kind: input, shape index: {}]   ;;  %s2690_s18 = inlined_call_operand.hbm [shape: bf16[128,128], index: 18, kind: input, shape index: {}]   ;;  %s2691_s19 = inlined_call_operand.hbm [shape: bf16[128,128], index: 19, kind: input, shape index: {}]   ;;  %s2692_s20 = inlined_call_operand.vmem [shape: f32[1,128], index: 20, kind: input, shape index: {}]   ;;  %s2693_s21 = inlined_call_operand.vmem [shape: f32[1,128], index: 21, kind: input, shape index: {}]   ;;  %s2694_s22 = inlined_call_operand.<no memory space> [shape: f32[1], index: 22, kind: input, shape index: {}]   ;;  %s2695_s23 = inlined_call_operand.hbm [shape: f32[16,128], index: 23, kind: output, shape index: {}]  }
   0x1   :  { %2696 = sst [smem:[#allocation48_spill]] %s2672_s0 }
   0x2   :  { %2697 = sst [smem:[#allocation49_spill]] %s2673_s1 }
   0x3   :  { %2698 = sst [smem:[#allocation50_spill]] %s2674_s2 }
   0x4   :  { %2699 = sst [smem:[#allocation51_spill]] %s2675_s3 }
   0x5   :  { %2700 = sst [smem:[#allocation52_spill]] %s2676_s4 }
   0x6   :  { %2701 = sst [smem:[#allocation53_spill]] %s2677_s5 }
   0x7   :  { %2702 = sst [smem:[#allocation54_spill]] %s2678_s6 }
   0x8   :  { %2703 = sst [smem:[#allocation55_spill]] %s2679_s7 }
   0x9   :  { %2704 = sst [smem:[#allocation56_spill]] %s2694_s22 }
   0xa   :  { %2705 = sst [smem:[#allocation57_spill]] %s2695_s23 }
   0xb   :  { %29 = vsyncpa [#allocation8], 0 }
   0xc   :  { %30 = vsyncpa [#allocation11], 0 }
   0xd   :  { %31 = vsyncpa [#allocation14], 0 }
   0xe   :  { %32 = vsyncpa [#allocation17], 0 }
   0xf   :  { %33 = vsyncpa [#allocation20], 0 }
  0x10   :  { %34 = vsyncpa [#allocation23], 0 }
  0x11   :  { %35 = vsyncpa [#allocation26], 0 }
  0x12   :  { %36 = vsyncpa [#allocation29], 0 }
  0x13   :  { %37 = vsyncpa [#allocation32], 0 }
  0x14   :  { %38 = vsyncpa [#allocation35], 0 }
  0x15   :  { %39 = vsyncpa [#allocation9], 0  ;;  %s2706_s24 = sld [smem:[#allocation49_spill]]  ;;  %s2409_s5 = smov [#allocation10]  }
  0x16   :  { %s59_s1 = sshll.u32 %s2409_s5, 4  ;;  %s2707_s6 = sld [smem:[#allocation51_spill]]  ;;  %s60_s1 = int_to_ptr.vmem [resolvable:$true] %s59_s1 }
  0x17   :  { %s2410_s7 = smov 64   ;;  %s2411_s28 = smov 4  }
  0x18   :  { %s2412_s29 = smov [#allocation13]   ;;  %s2708_s30 = sld [smem:[#allocation53_spill]] }
  0x19   :  { %s85_s3 = sshll.u32 %s2412_s29, 4  ;;  %s2709_s2 = sld [smem:[#allocation55_spill]]  ;;  %s86_s3 = int_to_ptr.vmem [resolvable:$true] %s85_s3 }
  0x1a   :  { %s2413_s23 = smov [#allocation16]   ;;  %s157_s4 = sshll.u32 %s2681_s9, 4  ;;  %s158_s4 = int_to_ptr.hbm [resolvable:$true] %s157_s4 }
  0x1b   :  { %s57_s25 = sshll.u32 %s2706_s24, 4  ;;  %s112_s22 = sshll.u32 %s2413_s23, 4  ;;  %s58_s25 = int_to_ptr.hbm [resolvable:$true] %s57_s25  ;;  %s113_s22 = int_to_ptr.vmem [resolvable:$true] %s112_s22 }
  0x1c   :  { %s83_s27 = sshll.u32 %s2707_s6, 4  ;;  %s2415_s23 = smov [#allocation22]   ;;  %s84_s27 = int_to_ptr.hbm [resolvable:$true] %s83_s27 }
  0x1d   :  { %65 = dma.hbm_to_vmem [thread:$0]  %s58_s25, 128, %s60_s1, [#allocation11], %s2410_s7, %s2410_s7, %s2411_s28  }
  0x1e   :  { %s110_s24 = sshll.u32 %s2708_s30, 4  ;;  %s2414_s25 = smov [#allocation19]   ;;  %s111_s24 = int_to_ptr.hbm [resolvable:$true] %s110_s24 }
  0x1f   :  { %91 = dma.hbm_to_vmem [thread:$0]  %s84_s27, 128, %s86_s3, [#allocation14], %s2410_s7, %s2410_s7, %s2411_s28  }
  0x20   :  { %s133_s6 = sshll.u32 %s2709_s2, 4  ;;  %s135_s1 = sshll.u32 %s2414_s25, 4  ;;  %s134_s6 = int_to_ptr.hbm [resolvable:$true] %s133_s6  ;;  %s136_s1 = int_to_ptr.vmem [resolvable:$true] %s135_s1 }
  0x21   :  { %115 = dma.hbm_to_vmem [thread:$0]  %s111_s24, 16, %s113_s22, [#allocation17]  }
  0x22   :  { %141 = dma.hbm_to_vmem [thread:$0]  %s134_s6, 1024, %s136_s1, [#allocation20], %s2410_s7, %s2410_s7, %s2411_s28  }
  0x23   :  { %s184_s30 = sshll.u32 %s2683_s11, 4  ;;  %s159_s5 = sshll.u32 %s2415_s23, 4  ;;  %s185_s30 = int_to_ptr.hbm [resolvable:$true] %s184_s30  ;;  %s160_s5 = int_to_ptr.vmem [resolvable:$true] %s159_s5 }
  0x24   :  { %165 = dma.hbm_to_vmem [thread:$0]  %s158_s4, 1024, %s160_s5, [#allocation23], %s2410_s7, %s2410_s7, %s2411_s28  }
  0x25   :  { %s2416_s22 = smov [#allocation25]   ;;  %s207_s2 = sshll.u32 %s2685_s13, 4  ;;  %s208_s2 = int_to_ptr.hbm [resolvable:$true] %s207_s2 }
  0x26   :  { %s186_s9 = sshll.u32 %s2416_s22, 4  ;;  %s231_s11 = sshll.u32 %s2687_s15, 4  ;;  %s187_s9 = int_to_ptr.vmem [resolvable:$true] %s186_s9  ;;  %s232_s11 = int_to_ptr.hbm [resolvable:$true] %s231_s11 }
  0x27   :  { %189 = dma.hbm_to_vmem [thread:$0]  %s185_s30, 16, %s187_s9, [#allocation26]  }
  0x28   :  { %s2417_s1 = smov [#allocation28]   ;;  %s2418_s0 = smov [#allocation31]  }
  0x29   :  { %s209_s29 = sshll.u32 %s2417_s1, 4  ;;  %s233_s4 = sshll.u32 %s2418_s0, 4  ;;  %s210_s29 = int_to_ptr.vmem [resolvable:$true] %s209_s29  ;;  %s234_s4 = int_to_ptr.vmem [resolvable:$true] %s233_s4 }
  0x2a   :  { %215 = dma.hbm_to_vmem [thread:$0]  %s208_s2, 1024, %s210_s29, [#allocation29], %s2410_s7, %s2410_s7, %s2411_s28  }
  0x2b   :  { %s2710_s13 = sld [smem:[#allocation48_spill]]  ;;  %s2419_s9 = smov [#allocation7]  }
  0x2c   :  { %239 = dma.hbm_to_vmem [thread:$0]  %s232_s11, 1024, %s234_s4, [#allocation32], %s2410_s7, %s2410_s7, %s2411_s28  }
  0x2d   :  { %s2711_s5 = sld [smem:[#allocation50_spill]]  ;;  %s46_s24 = sshll.u32 %s2419_s9, 4  ;;  %s47_s24 = int_to_ptr.vmem [resolvable:$true] %s46_s24 }
  0x2e   :  { %s2420_s26 = smov [#allocation12]   ;;  %s2712_s1 = sld [smem:[#allocation52_spill]] }
  0x2f   :  { %s72_s2 = sshll.u32 %s2420_s26, 4  ;;  %s2713_s4 = sld [smem:[#allocation54_spill]]  ;;  %s73_s2 = int_to_ptr.vmem [resolvable:$true] %s72_s2 }
  0x30   :  { %s2421_s3 = smov [#allocation15]   ;;  %s147_s9 = sshll.u32 %s2680_s8, 4  ;;  %s148_s9 = int_to_ptr.hbm [resolvable:$true] %s147_s9 }
  0x31   :  { %s44_s23 = sshll.u32 %s2710_s13, 4  ;;  %s98_s13 = sshll.u32 %s2421_s3, 4  ;;  %s45_s23 = int_to_ptr.hbm [resolvable:$true] %s44_s23  ;;  %s99_s13 = int_to_ptr.vmem [resolvable:$true] %s98_s13 }
  0x32   :  { %52 = dma.hbm_to_vmem [thread:$0]  %s45_s23, 128, %s47_s24, [#allocation8], %s2410_s7, %s2410_s7, %s2411_s28  }
  0x33   :  { %s70_s22 = sshll.u32 %s2711_s5, 4  ;;  %s2422_s23 = smov [#allocation18]   ;;  %s71_s22 = int_to_ptr.hbm [resolvable:$true] %s70_s22 }
  0x34   :  { %s96_s29 = sshll.u32 %s2712_s1, 4  ;;  %s122_s15 = sshll.u32 %s2422_s23, 4  ;;  %s97_s29 = int_to_ptr.hbm [resolvable:$true] %s96_s29  ;;  %s123_s15 = int_to_ptr.vmem [resolvable:$true] %s122_s15 }
  0x35   :  { %78 = dma.hbm_to_vmem [thread:$0]  %s71_s22, 128, %s73_s2, [#allocation11], %s2410_s7, %s2410_s7, %s2411_s28  }
  0x36   :  { %s120_s27 = sshll.u32 %s2713_s4, 4  ;;  %s170_s26 = sshll.u32 %s2682_s10, 4  ;;  %s121_s27 = int_to_ptr.hbm [resolvable:$true] %s120_s27  ;;  %s171_s26 = int_to_ptr.hbm [resolvable:$true] %s170_s26 }
  0x37   :  { %104 = dma.hbm_to_vmem [thread:$0]  %s97_s29, 1024, %s99_s13, [#allocation14], %s2410_s7, %s2410_s7, %s2411_s28  }
  0x38   :  { %128 = dma.hbm_to_vmem [thread:$0]  %s121_s27, 1024, %s123_s15, [#allocation17], %s2410_s7, %s2410_s7, %s2411_s28  }
  0x39   :  { %s2423_s2 = smov [#allocation21]   ;;  %s2424_s25 = smov [#allocation24]  }
  0x3a   :  { %s149_s6 = sshll.u32 %s2423_s2, 4  ;;  %s172_s1 = sshll.u32 %s2424_s25, 4  ;;  %s150_s6 = int_to_ptr.vmem [resolvable:$true] %s149_s6  ;;  %s173_s1 = int_to_ptr.vmem [resolvable:$true] %s172_s1 }
  0x3b   :  { %152 = dma.hbm_to_vmem [thread:$0]  %s148_s9, 16, %s150_s6, [#allocation20]  }
  0x3c   :  { %s194_s8 = sshll.u32 %s2684_s12, 4  ;;  %s221_s10 = sshll.u32 %s2686_s14, 4  ;;  %s195_s8 = int_to_ptr.hbm [resolvable:$true] %s194_s8  ;;  %s222_s10 = int_to_ptr.hbm [resolvable:$true] %s221_s10 }
  0x3d   :  { %178 = dma.hbm_to_vmem [thread:$0]  %s171_s26, 1024, %s173_s1, [#allocation23], %s2410_s7, %s2410_s7, %s2411_s28  }
  0x3e   :  { %s2425_s27 = smov [#allocation27]   ;;  %s2426_s13 = smov [#allocation30]  }
  0x3f   :  { %s196_s3 = sshll.u32 %s2425_s27, 4  ;;  %s223_s12 = sshll.u32 %s2426_s13, 4  ;;  %s197_s3 = int_to_ptr.vmem [resolvable:$true] %s196_s3  ;;  %s224_s12 = int_to_ptr.vmem [resolvable:$true] %s223_s12 }
  0x40   :  { %202 = dma.hbm_to_vmem [thread:$0]  %s195_s8, 1024, %s197_s3, [#allocation26], %s2410_s7, %s2410_s7, %s2411_s28  }
  0x41   :  { %s248_s30 = sshll.u32 %s2690_s18, 4  ;;  %s261_s14 = sshll.u32 %s2691_s19, 4  ;;  %s249_s30 = int_to_ptr.hbm [resolvable:$true] %s248_s30  ;;  %s262_s14 = int_to_ptr.hbm [resolvable:$true] %s261_s14 }
  0x42   :  { %226 = dma.hbm_to_vmem [thread:$0]  %s222_s10, 16, %s224_s12, [#allocation29]  }
  0x43   :  { %s2427_s22 = smov [#allocation33]   ;;  %s2428_s26 = smov [#allocation34]  }
  0x44   :  { %s250_s24 = sshll.u32 %s2427_s22, 4  ;;  %s263_s2 = sshll.u32 %s2428_s26, 4  ;;  %s251_s24 = int_to_ptr.vmem [resolvable:$true] %s250_s24  ;;  %s264_s2 = int_to_ptr.vmem [resolvable:$true] %s263_s2 }
  0x45   :  { %256 = dma.hbm_to_vmem [thread:$0]  %s249_s30, 1024, %s251_s24, [#allocation32], %s2410_s7, %s2410_s7, %s2411_s28  }
  0x46   :  { %269 = dma.hbm_to_vmem [thread:$0]  %s262_s14, 1024, %s264_s2, [#allocation35], %s2410_s7, %s2410_s7, %s2411_s28  }
  0x47   :  { %2387 = dma.done.wait [#allocation8], 128  }
  0x48   :  { %2388 = vsyncadd [#allocation8], 4294967168 }
  0x49   :  { %2389 = dma.done.wait [#allocation11], 256  }
  0x4a   :  { %2390 = vsyncadd [#allocation11], 4294967040 }
  0x4b   :  { %2391 = dma.done.wait [#allocation14], 1152  }
  0x4c   :  { %2392 = vsyncadd [#allocation14], 4294966144 }
  0x4d   :  { %2393 = dma.done.wait [#allocation17], 1040  }
  0x4e   :  { %2394 = vsyncadd [#allocation17], 4294966256 }
  0x4f   :  { %2395 = dma.done.wait [#allocation20], 1040  }
  0x50   :  { %2396 = vsyncadd [#allocation20], 4294966256 }
  0x51   :  { %2397 = dma.done.wait [#allocation23], 2048  }
  0x52   :  { %2398 = vsyncadd [#allocation23], 4294965248 }
  0x53   :  { %2399 = dma.done.wait [#allocation26], 1040  }
  0x54   :  { %2400 = vsyncadd [#allocation26], 4294966256 }
  0x55   :  { %2401 = dma.done.wait [#allocation29], 1040  }
  0x56   :  { %2402 = vsyncadd [#allocation29], 4294966256 }
  0x57   :  { %2403 = dma.done.wait [#allocation32], 2048  }
  0x58   :  { %2404 = vsyncadd [#allocation32], 4294965248 }
  0x59   :  { %2405 = dma.done.wait [#allocation35], 1024  }
  0x5a   :  { %2406 = vsyncadd [#allocation35], 4294966272  ;;  %v1813_v0 = vld [vmem:[#allocation12] sm:$0xff]  ;;  %v1832_v1 = vld [vmem:[#allocation13] sm:$0xff]  ;;  %vm399_vm0 = vcmask 130048   ;;  %s2429_s11 = smov [#allocation36]  }
  0x5b   :  { %v1812_v2 = vld [vmem:[#allocation7] sm:$0xff]  ;;  %v1831_v3 = vld [vmem:[#allocation10] sm:$0xff]  ;;  %v1822_v5 = vld [vmem:[#allocation15 + $0x38] sm:$0xff]  ;;  %410 = vmatpush.bf16.msra.mxu0 %v1813_v0  ;;  %617 = vmatpush.bf16.msra.mxu3 %v1832_v1  ;;  %s1422_s8 = sshll.u32 %s2429_s11, 4  ;;  %s2715_s4 = sld [smem:[#allocation57_spill]]  ;;  %s1423_s8 = int_to_ptr.vmem [resolvable:$true] %s1422_s8 }
  0x5c   :  { %v1830_v4 = vld [vmem:[#allocation18 + $0x38] sm:$0xff]  ;;  %533 = vmatpush.bf16.msra.mxu2 %v1822_v5  ;;  %v1829_v6 = vld [vmem:[#allocation18 + $0x30] sm:$0xff]  ;;  %v1828_v12 = vld [vmem:[#allocation18 + $0x28] sm:$0xff]  ;;  %s2430_s27 = smov 128   ;;  %s2431_s3 = smov 8  }
  0x5d   :  { %471 = vmatpush.bf16.msra.mxu1 %v1830_v4  ;;  %v1821_v7 = vld [vmem:[#allocation15 + $0x30] sm:$0xff]  ;;  %v1841_v8 = vld [vmem:[#allocation19 + $0x38] sm:$0xff]  ;;  %v1820_v13 = vld [vmem:[#allocation15 + $0x28] sm:$0xff] }
  0x5e   :  { %v1849_v9 = vld [vmem:[#allocation22 + $0x38] sm:$0xff]  ;;  %1454 = vmatmul.msk.bf16.vlgmr.msra.gmra.mxu0 %vm399_vm0, %v1812_v2  ;;  %1531 = vmatmul.msk.bf16.vlgmr.msra.gmra.mxu3 %vm399_vm0, %v1831_v3  ;;  %v1840_v10 = vld [vmem:[#allocation19 + $0x30] sm:$0xff]  ;;  %v1839_v16 = vld [vmem:[#allocation19 + $0x28] sm:$0xff] }
  0x5f   :  { %740 = vmatpush.bf16.msrb.mxu3 %v1841_v8  ;;  %678 = vmatpush.bf16.msrb.mxu0 %v1849_v9  ;;  %v1848_v11 = vld [vmem:[#allocation22 + $0x30] sm:$0xff]  ;;  %v1827_v14 = vld [vmem:[#allocation18 + $0x20] sm:$0xff]  ;;  %v1847_v17 = vld [vmem:[#allocation22 + $0x28] sm:$0xff] }
  0x60   :  { %534 = vmatpush.bf16.msra.mxu2 %v1821_v7  ;;  %v1819_v15 = vld [vmem:[#allocation15 + $0x20] sm:$0xff]  ;;  %v1818_v21 = vld [vmem:[#allocation15 + $0x18] sm:$0xff]  ;;  %v1817_v25 = vld [vmem:[#allocation15 + $0x10] sm:$0xff] }
  0x61   :  { %472 = vmatpush.bf16.msra.mxu1 %v1829_v6  ;;  %v1838_v18 = vld [vmem:[#allocation19 + $0x20] sm:$0xff]  ;;  %v1826_v20 = vld [vmem:[#allocation18 + $0x18] sm:$0xff]  ;;  %v1825_v24 = vld [vmem:[#allocation18 + $0x10] sm:$0xff]  ;;  %s1424_s10 = sshll.u32 %s2715_s4, 4  ;;  %s1425_s10 = int_to_ptr.hbm [resolvable:$true] %s1424_s10 }
  0x62   :  { %v1846_v19 = vld [vmem:[#allocation22 + $0x20] sm:$0xff]  ;;  %v1837_v22 = vld [vmem:[#allocation19 + $0x18] sm:$0xff]  ;;  %v1836_v26 = vld [vmem:[#allocation19 + $0x10] sm:$0xff] }
  0x63   :  { %741 = vmatpush.bf16.msrb.mxu3 %v1840_v10  ;;  %679 = vmatpush.bf16.msrb.mxu0 %v1848_v11  ;;  %v1845_v23 = vld [vmem:[#allocation22 + $0x18] sm:$0xff]  ;;  %v1824_v27 = vld [vmem:[#allocation18 + $0x8] sm:$0xff]  ;;  %v1844_v33 = vld [vmem:[#allocation22 + $0x10] sm:$0xff] }
  0x64   :  { %535 = vmatpush.bf16.msra.mxu2 %v1820_v13  ;;  %v1816_v28 = vld [vmem:[#allocation15 + $0x8] sm:$0xff]  ;;  %v1815_v30 = vld [vmem:[#allocation15] sm:$0xff]  ;;  %v1814_v31 = vld [vmem:[#allocation13] sm:$0xff] }
  0x65   :  { %473 = vmatpush.bf16.msra.mxu1 %v1828_v12  ;;  %v1823_v29 = vld [vmem:[#allocation18] sm:$0xff]  ;;  %v1835_v32 = vld [vmem:[#allocation19 + $0x8] sm:$0xff]  ;;  %v1865_v39 = vld [vmem:[#allocation27 + $0x30] sm:$0xff] }
  0x66   :  { %v1834_v34 = vld [vmem:[#allocation19] sm:$0xff]  ;;  %v1843_v35 = vld [vmem:[#allocation22 + $0x8] sm:$0xff]  ;;  %v1882_v44 = vld [vmem:[#allocation31 + $0x30] sm:$0xff] }
  0x67   :  { %742 = vmatpush.bf16.msrb.mxu3 %v1839_v16  ;;  %680 = vmatpush.bf16.msrb.mxu0 %v1847_v17  ;;  %v1842_v36 = vld [vmem:[#allocation22] sm:$0xff]  ;;  %v1833_v37 = vld [vmem:[#allocation12] sm:$0xff]  ;;  %v1878_v55 = vld [vmem:[#allocation31 + $0x10] sm:$0xff] }
  0x68   :  { %536 = vmatpush.bf16.msra.mxu2 %v1819_v15  ;;  %v1866_v38 = vld [vmem:[#allocation27 + $0x38] sm:$0xff]  ;;  %v1864_v40 = vld [vmem:[#allocation27 + $0x28] sm:$0xff]  ;;  %v1863_v41 = vld [vmem:[#allocation27 + $0x20] sm:$0xff] }
  0x69   :  { %474 = vmatpush.bf16.msra.mxu1 %v1827_v14  ;;  %v1883_v42 = vld [vmem:[#allocation31 + $0x38] sm:$0xff]  ;;  %v1861_v46 = vld [vmem:[#allocation27 + $0x10] sm:$0xff]  ;;  %v1860_v50 = vld [vmem:[#allocation27 + $0x8] sm:$0xff] }
  0x6a   :  { %v1862_v43 = vld [vmem:[#allocation27 + $0x18] sm:$0xff]  ;;  %v1881_v51 = vld [vmem:[#allocation31 + $0x28] sm:$0xff]  ;;  %v1859_v52 = vld [vmem:[#allocation27] sm:$0xff] }
  0x6b   :  { %743 = vmatpush.bf16.msrb.mxu3 %v1838_v18  ;;  %681 = vmatpush.bf16.msrb.mxu0 %v1846_v19  ;;  %v1880_v53 = vld [vmem:[#allocation31 + $0x20] sm:$0xff]  ;;  %v1879_v54 = vld [vmem:[#allocation31 + $0x18] sm:$0xff]  ;;  %v1877_v56 = vld [vmem:[#allocation31 + $0x8] sm:$0xff] }
  0x6c   :  { %537 = vmatpush.bf16.msra.mxu2 %v1818_v21  ;;  %v1876_v57 = vld [vmem:[#allocation31] sm:$0xff]  ;;  %v1925_v59 = vld [vmem:[#allocation16] ss:$0 sm:$0xff]  ;;  %v1926_v3 = vld [vmem:[#allocation21] ss:$0 sm:$0xff] }
  0x6d   :  { %475 = vmatpush.bf16.msra.mxu1 %v1826_v20  ;;  %v1867_v13 = vld [vmem:[#allocation10] sm:$0xff]  ;;  %v1875_v15 = vld [vmem:[#allocation28 + $0x38] sm:$0xff]  ;;  %v1874_v18 = vld [vmem:[#allocation28 + $0x30] sm:$0xff] }
  0x6e   :  { %v1850_v19 = vld [vmem:[#allocation7] sm:$0xff]  ;;  %v1873_v21 = vld [vmem:[#allocation28 + $0x28] sm:$0xff] }
  0x6f   :  { %744 = vmatpush.bf16.msrb.mxu3 %v1837_v22  ;;  %682 = vmatpush.bf16.msrb.mxu0 %v1845_v23  ;;  %v1858_v20 = vld [vmem:[#allocation24 + $0x38] sm:$0xff]  ;;  %v1857_v22 = vld [vmem:[#allocation24 + $0x30] sm:$0xff]  ;;  %v1872_v23 = vld [vmem:[#allocation28 + $0x20] sm:$0xff] }
  0x70   :  { %538 = vmatpush.bf16.msra.mxu2 %v1817_v25  ;;  %v1871_v25 = vld [vmem:[#allocation28 + $0x18] sm:$0xff] }
  0x71   :  { %476 = vmatpush.bf16.msra.mxu1 %v1825_v24  ;;  %v1856_v24 = vld [vmem:[#allocation24 + $0x28] sm:$0xff] }
  0x73   :  { %745 = vmatpush.bf16.msrb.mxu3 %v1836_v26  ;;  %683 = vmatpush.bf16.msrb.mxu0 %v1844_v33  ;;  %v1855_v26 = vld [vmem:[#allocation24 + $0x20] sm:$0xff] }
  0x74   :  { %539 = vmatpush.bf16.msra.mxu2 %v1816_v28  ;;  %v1853_v28 = vld [vmem:[#allocation24 + $0x10] sm:$0xff]  ;;  %v1868_v33 = vld [vmem:[#allocation28] sm:$0xff] }
  0x75   :  { %477 = vmatpush.bf16.msra.mxu1 %v1824_v27  ;;  %v1854_v27 = vld [vmem:[#allocation24 + $0x18] sm:$0xff] }
  0x77   :  { %746 = vmatpush.bf16.msrb.mxu3 %v1835_v32  ;;  %684 = vmatpush.bf16.msrb.mxu0 %v1843_v35  ;;  %v1851_v32 = vld [vmem:[#allocation24] sm:$0xff] }
  0x78   :  { %540 = vmatpush.bf16.msra.mxu2 %v1815_v30  ;;  %v1852_v30 = vld [vmem:[#allocation24 + $0x8] sm:$0xff] }
  0x79   :  { %478 = vmatpush.bf16.msra.mxu1 %v1823_v29  ;;  %v1870_v29 = vld [vmem:[#allocation28 + $0x10] sm:$0xff] }
  0x7b   :  { %747 = vmatpush.bf16.msrb.mxu3 %v1834_v34  ;;  %685 = vmatpush.bf16.msrb.mxu0 %v1842_v36 }
  0x7c   :  { %479 = vmatmul.bf16.vlgmr.msra.gmra.mxu1 %v1814_v31  ;;  %881 = vmatpush.bf16.msrb.mxu2 %v1866_v38  ;;  %v1869_v31 = vld [vmem:[#allocation28 + $0x8] sm:$0xff]  ;;  %v1893_v38 = vld [vmem:[#allocation33 + $0x38] sm:$0xff] }
  0x7d   :  { %1083 = vmatpush.bf16.msrb.mxu1 %v1883_v42  ;;  %v1891_v42 = vld [vmem:[#allocation33 + $0x28] sm:$0xff] }
  0x7e   :  { %686 = vmatmul.bf16.vlgmr.msrb.gmra.mxu0 %v1833_v37 }
  0x80   :  { %882 = vmatpush.bf16.msrb.mxu2 %v1865_v39  ;;  %v1901_v39 = vld [vmem:[#allocation34 + $0x38] sm:$0xff] }
  0x81   :  { %1084 = vmatpush.bf16.msrb.mxu1 %v1882_v44 }
  0x84   :  { %883 = vmatpush.bf16.msrb.mxu2 %v1864_v40  ;;  %v1892_v40 = vld [vmem:[#allocation33 + $0x30] sm:$0xff] }
  0x85   :  { %1085 = vmatpush.bf16.msrb.mxu1 %v1881_v51 }
  0x88   :  { %884 = vmatpush.bf16.msrb.mxu2 %v1863_v41  ;;  %v1900_v41 = vld [vmem:[#allocation34 + $0x30] sm:$0xff] }
  0x89   :  { %1086 = vmatpush.bf16.msrb.mxu1 %v1880_v53 }
  0x8c   :  { %885 = vmatpush.bf16.msrb.mxu2 %v1862_v43  ;;  %v1899_v43 = vld [vmem:[#allocation34 + $0x28] sm:$0xff] }
  0x8d   :  { %1087 = vmatpush.bf16.msrb.mxu1 %v1879_v54  ;;  %v1888_v54 = vld [vmem:[#allocation33 + $0x10] sm:$0xff] }
  0x90   :  { %886 = vmatpush.bf16.msrb.mxu2 %v1861_v46  ;;  %v1890_v46 = vld [vmem:[#allocation33 + $0x20] sm:$0xff] }
  0x91   :  { %1088 = vmatpush.bf16.msrb.mxu1 %v1878_v55 }
  0x94   :  { %887 = vmatpush.bf16.msrb.mxu2 %v1860_v50  ;;  %v1897_v50 = vld [vmem:[#allocation34 + $0x18] sm:$0xff] }
  0x95   :  { %1089 = vmatpush.bf16.msrb.mxu1 %v1877_v56  ;;  %v1927_v56 = vld [vmem:[#allocation25] ss:$0 sm:$0xff] }
  0x98   :  { %888 = vmatpush.bf16.msrb.mxu2 %v1859_v52 }
  0x99   :  { %1090 = vmatpush.bf16.msrb.mxu1 %v1876_v57 }
  0x9d   :  { %1316 = vmatpush.bf16.msra.mxu1 %v1901_v39 }
  0xa1   :  { %1317 = vmatpush.bf16.msra.mxu1 %v1900_v41 }
  0xa5   :  { %1318 = vmatpush.bf16.msra.mxu1 %v1899_v43 }
  0xdb   :  { %v412_v45 = vpop.f32.mrf.mxu0 }
  0xdc   :  { %541 = vmatmul.f32.vlgmr.msra.gmra.mxu2 %v412_v45 }
  0xdd   :  { %1379 = vmatpush.bf16.msra.mxu2 %v1893_v38 }
  0xe1   :  { %v619_v47 = vpop.f32.mrf.mxu3  ;;  %1380 = vmatpush.bf16.msra.mxu2 %v1892_v40 }
  0xe2   :  { %748 = vmatmul.f32.vlgmr.msrb.gmra.mxu3 %v619_v47  ;;  %v1898_v47 = vld [vmem:[#allocation34 + $0x20] sm:$0xff] }
  0xe3   :  { %v414_v48 = vpop.f32.mrf.mxu0  ;;  %1319 = vmatpush.bf16.msra.mxu1 %v1898_v47 }
  0xe4   :  { %544 = vmatmul.f32.gmra.mxu2 %v414_v48 }
  0xe5   :  { %1381 = vmatpush.bf16.msra.mxu2 %v1891_v42 }
  0xe7   :  { %1320 = vmatpush.bf16.msra.mxu1 %v1897_v50 }
  0xe9   :  { %v621_v49 = vpop.f32.mrf.mxu3  ;;  %1382 = vmatpush.bf16.msra.mxu2 %v1890_v46 }
  0xea   :  { %751 = vmatmul.f32.gmra.mxu3 %v621_v49  ;;  %v1889_v49 = vld [vmem:[#allocation33 + $0x18] sm:$0xff] }
  0xed   :  { %1383 = vmatpush.bf16.msra.mxu2 %v1889_v49 }
  0xf1   :  { %1384 = vmatpush.bf16.msra.mxu2 %v1888_v54 }
  0xf9   :  { %v480_v58 = vpop.f32.mrf.mxu1 }
  0xfb   :  { %v687_v62 = vpop.f32.mrf.mxu0 }
 0x101   :  { %v482_v4 = vpop.f32.mrf.mxu1 }
 0x103   :  { %v689_v10 = vpop.f32.mrf.mxu0 }
 0x15f   :  { %v542_v60 = vpop.f32.mrf.mxu2 }
 0x160   :  { %v543_v61 = vadd.f32 %v542_v60, %v480_v58  ;;  %v1896_v58 = vld [vmem:[#allocation34 + $0x10] sm:$0xff]  ;;  %v1885_v60 = vld [vmem:[%s2689_s17] sm:$0xff] }
 0x161   :  { %1321 = vmatpush.bf16.msra.mxu1 %v1896_v58 }
 0x162   :  { %v551_v63 = vadd.f32 %v1925_v59, %v543_v61  ;;  %v1887_v61 = vld [vmem:[#allocation33 + $0x8] sm:$0xff] }
 0x163   :  { %1385 = vmatpush.bf16.msra.mxu2 %v1887_v61 }
 0x164   :  { %v553_v0 = vmax.f32 %v551_v63, 0.0 }
 0x165   :  { %v749_v1 = vpop.f32.mrf.mxu3 }
 0x166   :  { %v750_v2 = vadd.f32 %v749_v1, %v687_v62  ;;  %889 = vmatmul.f32.vlgmr.msrb.gmra.mxu2 %v553_v0 }
 0x167   :  { %v545_v5 = vpop.f32.mrf.mxu2 }
 0x168   :  { %v758_v6 = vadd.f32 %v1926_v3, %v750_v2  ;;  %v546_v7 = vadd.f32 %v545_v5, %v482_v4  ;;  %v1928_v2 = vld [vmem:[#allocation30] ss:$0 sm:$0xff]  ;;  %v1886_v4 = vld [vmem:[#allocation33] sm:$0xff] }
 0x169   :  { %1386 = vmatpush.bf16.msra.mxu2 %v1886_v4 }
 0x16a   :  { %v760_v8 = vmax.f32 %v758_v6, 0.0  ;;  %v552_v9 = vadd.f32 %v1925_v59, %v546_v7  ;;  %v1884_v6 = vld [vmem:[%s2688_s16] sm:$0xff] }
 0x16c   :  { %v554_v11 = vmax.f32 %v552_v9, 0.0  ;;  %1091 = vmatmul.f32.vlgmr.msrb.gmra.mxu1 %v760_v8  ;;  %v1894_v9 = vld [vmem:[#allocation34] sm:$0xff] }
 0x16d   :  { %v752_v12 = vpop.f32.mrf.mxu3 }
 0x16e   :  { %v753_v14 = vadd.f32 %v752_v12, %v689_v10  ;;  %892 = vmatmul.f32.gmra.mxu2 %v554_v11  ;;  %1027 = vmatpush.msra.mxu3 %v554_v11 }
 0x170   :  { %v759_v16 = vadd.f32 %v1926_v3, %v753_v14  ;;  %1028 = vmatpush.msra.mxu3 %v553_v0 }
 0x171   :  { %1673 = vmatmul.msk.bf16.vlgmr.msra.gmra.mxu3 %vm399_vm0, %v1867_v13 }
 0x172   :  { %v761_v17 = vmax.f32 %v759_v16, 0.0  ;;  %1146 = vmatpush.bf16.msrb.mxu3 %v1875_v15  ;;  %v1929_v15 = vld [vmem:[%s2692_s20] ss:$0 sm:$0xff]  ;;  %s2714_s20 = sld [smem:[#allocation56_spill]] }
 0x174   :  { %825 = vmatpush.msra.mxu0 %v761_v17  ;;  %1094 = vmatmul.f32.gmra.mxu1 %v761_v17 }
 0x176   :  { %826 = vmatpush.msra.mxu0 %v760_v8  ;;  %1147 = vmatpush.bf16.msrb.mxu3 %v1874_v18  ;;  %v1895_v8 = vld [vmem:[#allocation34 + $0x8] sm:$0xff] }
 0x177   :  { %1604 = vmatmul.msk.bf16.vlgmr.msra.gmra.mxu0 %vm399_vm0, %v1850_v19  ;;  %1322 = vmatpush.bf16.msra.mxu1 %v1895_v8  ;;  %v1930_v19 = vld [vmem:[%s2693_s21] ss:$0 sm:$0xff] }
 0x178   :  { %944 = vmatpush.bf16.msrb.mxu0 %v1858_v20 }
 0x17a   :  { %1148 = vmatpush.bf16.msrb.mxu3 %v1873_v21 }
 0x17b   :  { %1323 = vmatpush.bf16.msra.mxu1 %v1894_v9 }
 0x17c   :  { %945 = vmatpush.bf16.msrb.mxu0 %v1857_v22 }
 0x17e   :  { %1149 = vmatpush.bf16.msrb.mxu3 %v1872_v23 }
 0x180   :  { %946 = vmatpush.bf16.msrb.mxu0 %v1856_v24 }
 0x182   :  { %1150 = vmatpush.bf16.msrb.mxu3 %v1871_v25 }
 0x184   :  { %947 = vmatpush.bf16.msrb.mxu0 %v1855_v26 }
 0x186   :  { %1151 = vmatpush.bf16.msrb.mxu3 %v1870_v29 }
 0x188   :  { %948 = vmatpush.bf16.msrb.mxu0 %v1854_v27 }
 0x18a   :  { %1152 = vmatpush.bf16.msrb.mxu3 %v1869_v31 }
 0x18c   :  { %949 = vmatpush.bf16.msrb.mxu0 %v1853_v28  ;;  %v1413_v28 = vstv %s2714_s20 }
 0x18e   :  { %1153 = vmatpush.bf16.msrb.mxu3 %v1868_v33 }
 0x190   :  { %950 = vmatpush.bf16.msrb.mxu0 %v1852_v30 }
 0x194   :  { %951 = vmatpush.bf16.msrb.mxu0 %v1851_v32 }
 0x1e9   :  { %v890_v44 = vpop.f32.mrf.mxu2  ;;  %v1092_v48 = vpop.f32.mrf.mxu1 }
 0x1f1   :  { %v893_v52 = vpop.f32.mrf.mxu2  ;;  %v1095_v63 = vpop.f32.mrf.mxu1 }
 0x1f4   :  { %v828_v34 = vpop.f32.mrf.mxu0  ;;  %v1030_v35 = vpop.f32.mrf.mxu3 }
 0x1f5   :  { %952 = vmatmul.f32.vlgmr.msrb.gmra.mxu0 %v828_v34  ;;  %1154 = vmatmul.f32.vlgmr.msrb.gmra.mxu3 %v1030_v35 }
 0x1fc   :  { %v830_v36 = vpop.f32.mrf.mxu0  ;;  %v1032_v37 = vpop.f32.mrf.mxu3 }
 0x1fd   :  { %955 = vmatmul.f32.gmra.mxu0 %v830_v36  ;;  %1157 = vmatmul.f32.gmra.mxu3 %v1032_v37 }
 0x272   :  { %v953_v45 = vpop.f32.mrf.mxu0 }
 0x273   :  { %v954_v55 = vadd.f32 %v953_v45, %v890_v44 }
 0x275   :  { %v962_v62 = vadd.f32 %v1927_v56, %v954_v55 }
 0x278   :  { %v1155_v51 = vpop.f32.mrf.mxu3 }
 0x279   :  { %v1156_v1 = vadd.f32 %v1155_v51, %v1092_v48 }
 0x27a   :  { %v956_v53 = vpop.f32.mrf.mxu0 }
 0x27b   :  { %v957_v57 = vadd.f32 %v956_v53, %v893_v52  ;;  %v1164_v7 = vadd.f32 %v1928_v2, %v1156_v1 }
 0x27d   :  { %v963_v59 = vadd.f32 %v1927_v56, %v957_v57 }
 0x27f   :  { %1228 = vmatpush.msra.mxu0 %v963_v59 }
 0x280   :  { %v1158_v0 = vpop.f32.mrf.mxu3 }
 0x281   :  { %v1159_v3 = vadd.f32 %v1158_v0, %v1095_v63  ;;  %1229 = vmatpush.msra.mxu0 %v962_v62 }
 0x282   :  { %1747 = vmatmul.msk.bf16.vlgmr.msra.gmra.mxu0 %vm399_vm0, %v1885_v60 }
 0x283   :  { %v1165_v5 = vadd.f32 %v1928_v2, %v1159_v3 }
 0x285   :  { %1194 = vmatpush.msra.mxu3 %v1165_v5 }
 0x287   :  { %1195 = vmatpush.msra.mxu3 %v1164_v7 }
 0x288   :  { %1742 = vmatmul.msk.bf16.vlgmr.msra.gmra.mxu3 %vm399_vm0, %v1884_v6 }
 0x2ff   :  { %v1231_v10 = vpop.f32.mrf.mxu0 }
 0x300   :  { %1324 = vmatmul.f32.vlgmr.msra.gmra.mxu1 %v1231_v10 }
 0x307   :  { %v1233_v11 = vpop.f32.mrf.mxu0 }
 0x308   :  { %1327 = vmatmul.f32.gmra.mxu1 %v1233_v11 }
 0x30b   :  { %v1197_v12 = vpop.f32.mrf.mxu3 }
 0x30c   :  { %1387 = vmatmul.f32.vlgmr.msra.gmra.mxu2 %v1197_v12 }
 0x313   :  { %v1199_v13 = vpop.f32.mrf.mxu3 }
 0x314   :  { %1390 = vmatmul.f32.gmra.mxu2 %v1199_v13 }
 0x37d   :  { %v1325_v14 = vpop.f32.mrf.mxu1 }
 0x385   :  { %v1328_v22 = vpop.f32.mrf.mxu1 }
 0x38f   :  { %v1388_v16 = vpop.f32.mrf.mxu2 }
 0x390   :  { %v1389_v17 = vadd.f32 %v1388_v16, %v1325_v14 }
 0x392   :  { %v1398_v18 = vadd.f32 %v1929_v15, %v1389_v17 }
 0x394   :  { %v1400_v20 = vmax.f32 %v1398_v18, 0.0 }
 0x396   :  { %v1406_v21 = vmul.f32 %v1930_v19, %v1400_v20 }
 0x397   :  { %v1391_v23 = vpop.f32.mrf.mxu2 }
 0x398   :  { %v1392_v24 = vadd.f32 %v1391_v23, %v1328_v22  ;;  %1408 = vadd.xlane.f32.xlu0 %v1406_v21 }
 0x39a   :  { %v1399_v25 = vadd.f32 %v1929_v15, %v1392_v24 }
 0x39c   :  { %v1401_v26 = vmax.f32 %v1399_v25, 0.0 }
 0x39e   :  { %v1407_v27 = vmul.f32 %v1930_v19, %v1401_v26 }
 0x3a0   :  { %1410 = vadd.xlane.f32.xlu0 %v1407_v27 }
 0x40b   :  { %v1409_v29 = vpop.xlane.xlu0 %1408 }
 0x40c   :  { %v1414_v30 = vadd.f32 %v1413_v28, %v1409_v29 }
 0x40e   :  { %1416 = vst [vmem:[#allocation36] sm:$0xff] %v1414_v30 }
 0x413   :  { %v1411_v31 = vpop.xlane.xlu0 %1410 }
 0x414   :  { %v1415_v32 = vadd.f32 %v1413_v28, %v1411_v31 }
 0x416   :  { %1417 = vst [vmem:[#allocation36 + $0x8] sm:$0xff] %v1415_v32 }
 0x417   :  { %1430 = dma.vmem_to_hbm [thread:$0]  %s1423_s8, 256, %s1425_s10, [#allocation9], %s2430_s27, %s2430_s27, %s2431_s3  }
 0x418   :  { %2407 = dma.done.wait [#allocation9], 256  }
 0x419   :  { %2408 = vsyncadd [#allocation9], 4294967040 }
 0x41a   :  { %1435 = vsyncpa [#allocation8], 1 }
 0x41b   :  { %1436 = vsyncpa [#allocation11], 1 }
 0x41c   :  { %1437 = vsyncpa [#allocation14], 1 }
 0x41d   :  { %1438 = vsyncpa [#allocation17], 1 }
 0x41e   :  { %1439 = vsyncpa [#allocation20], 1 }
 0x41f   :  { %1440 = vsyncpa [#allocation23], 1 }
 0x420   :  { %1441 = vsyncpa [#allocation26], 1 }
 0x421   :  { %1442 = vsyncpa [#allocation29], 1 }
 0x422   :  { %1443 = vsyncpa [#allocation32], 1 }
 0x423   :  { %1444 = vsyncpa [#allocation35], 1 }
 0x424   :  { %1445 = vsyncpa [#allocation9], 1 }

</bundles_post_ra>
